<compile_context>
chip_gen: v5e
topology: v5e:2x2
jax: 0.10.0
libtpu: 0.0.40
codegen_flags: <defaults>
</compile_context>

<pallas_src>
import math
import functools

import jax
import jax.numpy as jnp
from jax.experimental import pallas as pl
from jax.experimental.pallas import tpu as pltpu


def _lstm_decoder_kernel(x_ref, w_ih_ref, b_ref, w_hh_ref, w_lin_ref, b_lin_ref,
                         o_ref, hist_ref, *, n_step, batch_pad, hidden_dim):
    """Single-block kernel on the time-major padded layout.

    x_ref:    (T*Bp, D)  padded tokens, row t*Bp + b = token t of sentence b
    o_ref:    (T*Bp, O)  padded per-token logits (same row layout)
    hist_ref: (T*Bp, H)  VMEM scratch holding every step's hidden states
    """
    H = hidden_dim
    Bp = batch_pad
    T = n_step

    # (1) Fused input projection for every padded token: ONE lane-dense MXU
    #     matmul (4H = 128 lanes); both LSTM biases folded in exactly once.
    gx = jnp.dot(x_ref[...], w_ih_ref[...],
                 preferred_element_type=jnp.float32) + b_ref[...]          # (T*Bp, 4H)

    w_hh = w_hh_ref[...]                                                   # (H, 4H)

    # (2) Batch-parallel recurrence: sentences along sublanes (Bp is a multiple
    #     of 8, so per-step slices and history stores are tile-aligned and
    #     unmasked along sublanes).  Padded steps only pollute their own lane's
    #     state, which is never emitted, so no masking is needed.
    h = jnp.zeros((Bp, H), jnp.float32)
    c = jnp.zeros((Bp, H), jnp.float32)
    for t in range(T):
        xg_t = gx[t * Bp:(t + 1) * Bp, :]                     # static, tile-aligned slice
        gates = xg_t + jnp.dot(h, w_hh, preferred_element_type=jnp.float32)
        sig = jax.nn.sigmoid(gates)                           # one EUP pass over (Bp, 4H)
        tnh = jnp.tanh(gates)                                 # one EUP pass over (Bp, 4H)
        i_g = sig[:, 0 * H:1 * H]
        f_g = sig[:, 1 * H:2 * H]
        g_g = tnh[:, 2 * H:3 * H]
        o_g = sig[:, 3 * H:4 * H]
        c = f_g * c + i_g * g_g
        h = o_g * jnp.tanh(c)
        hist_ref[pl.ds(t * Bp, Bp), :] = h                    # contiguous aligned store

    # (3) Fused output Linear over the whole padded hidden history: ONE matmul,
    #     ONE dense store.
    o_ref[...] = (jnp.dot(hist_ref[...], w_lin_ref[...],
                          preferred_element_type=jnp.float32) + b_lin_ref[...])


def lstm_decoder_forward(encoded_hiddens, seq_lens, params, extra_input=None):
    """encoded_hiddens: flat (sum(seq_lens), input_dim) tokens -> (N, output_dim)."""
    if extra_input is not None:
        encoded_hiddens = jnp.concatenate(
            [encoded_hiddens, extra_input.astype(encoded_hiddens.dtype)], axis=-1)
    # TODO(synk): embedding_dim branches (teacher-forced label embedding and
    # autoregressive top-k feedback) are not implemented; this covers the
    # embedding_dim=None configuration.  Dropout is identity in eval mode.
    seq_lens = tuple(int(L) for L in seq_lens)
    H = params["w_hh"].shape[0]
    O = params["w_lin"].shape[1]

    # Zero-length sentences emit no output rows and do not shift the offsets
    # of the remaining sentences, so they can simply be dropped.
    lens = tuple(L for L in seq_lens if L > 0)
    if not lens:
        return jnp.zeros((0, O), jnp.float32)

    B = len(lens)
    Bp = max(8, -(-B // 8) * 8)      # sentences rounded up to a sublane multiple
    T = max(lens)
    N = sum(lens)

    offs = [0]
    for L in lens:
        offs.append(offs[-1] + L)

    # Time-major padded gather: padded row t*Bp + b <- flat token offs[b] + min(t, L_b - 1)
    # (clamped past the sentence end; dummy lanes b >= B just re-read token 0).
    pad_idx = []
    for t in range(T):
        for b in range(Bp):
            pad_idx.append(offs[b] + min(t, lens[b] - 1) if b < B else 0)
    pad_idx = jnp.asarray(pad_idx, jnp.int32)

    # Flat (sentence-major) row offs[b] + t lives at padded row t*Bp + b.
    flat_idx = [0] * N
    for b in range(B):
        for t in range(lens[b]):
            flat_idx[offs[b] + t] = t * Bp + b
    flat_idx = jnp.asarray(flat_idx, jnp.int32)

    x_pad = jnp.take(encoded_hiddens.astype(jnp.float32), pad_idx, axis=0)   # (T*Bp, D)

    b_gates = (params["b_ih"] + params["b_hh"]).reshape(1, 4 * H).astype(jnp.float32)
    b_lin = params["b_lin"].reshape(1, O).astype(jnp.float32)

    kernel = functools.partial(_lstm_decoder_kernel,
                               n_step=T, batch_pad=Bp, hidden_dim=H)

    # Whole problem fits comfortably in VMEM at these shapes: single block,
    # no grid, whole-array default BlockSpecs, one VMEM history scratch.
    out_pad = pl.pallas_call(
        kernel,
        out_shape=jax.ShapeDtypeStruct((T * Bp, O), jnp.float32),
        scratch_shapes=[pltpu.VMEM((T * Bp, H), jnp.float32)],
    )(x_pad, params["w_ih"].astype(jnp.float32), b_gates,
      params["w_hh"].astype(jnp.float32), params["w_lin"].astype(jnp.float32),
      b_lin)

    # Padded -> flat compaction: one XLA gather in the wrapper.
    return jnp.take(out_pad, flat_idx, axis=0)


def _reference_forward(encoded_hiddens, seq_lens, params, extra_input=None):
    """Pure-JAX reference mirroring the PyTorch LSTMDecoder (eval mode)."""
    if extra_input is not None:
        x_all = jnp.concatenate(
            [encoded_hiddens, extra_input.astype(encoded_hiddens.dtype)], axis=-1)
    else:
        x_all = encoded_hiddens
    H = params["w_hh"].shape[0]
    hp = jax.lax.Precision.HIGHEST
    b = params["b_ih"] + params["b_hh"]
    outs = []
    start = 0
    for L in seq_lens:
        h = jnp.zeros((H,), jnp.float32)
        c = jnp.zeros((H,), jnp.float32)
        for t in range(L):
            x_t = x_all[start + t]
            g = (jnp.dot(x_t, params["w_ih"], precision=hp)
                 + jnp.dot(h, params["w_hh"], precision=hp) + b)
            i_g = jax.nn.sigmoid(g[0 * H:1 * H])
            f_g = jax.nn.sigmoid(g[1 * H:2 * H])
            g_g = jnp.tanh(g[2 * H:3 * H])
            o_g = jax.nn.sigmoid(g[3 * H:4 * H])
            c = f_g * c + i_g * g_g
            h = o_g * jnp.tanh(c)
            outs.append(jnp.dot(h, params["w_lin"], precision=hp) + params["b_lin"])
        start += L
    return jnp.stack(outs, axis=0)


if __name__ == "__main__":
    input_dim = 64      # encoder hidden size
    hidden_dim = 32     # LSTM hidden size -> 4H = 128 (full lane width)
    output_dim = 32     # number of labels
    dropout_rate = 0.4  # eval mode -> identity (kept only for parity)
    seq_lens = [8, 6, 5]
    total = sum(seq_lens)

    key = jax.random.PRNGKey(0)
    kx, kwi, kwh, kbi, kbh, kwl, kbl = jax.random.split(key, 7)

    encoded = jax.random.normal(kx, (total, input_dim), jnp.float32)

    bound = 1.0 / math.sqrt(hidden_dim)   # PyTorch nn.LSTM / nn.Linear init bound

    def uni(k, shape, b):
        return jax.random.uniform(k, shape, jnp.float32, minval=-b, maxval=b)

    params = {
        # Stored transposed wrt PyTorch (x @ w_ih, h @ w_hh); gate order i,f,g,o.
        "w_ih": uni(kwi, (input_dim, 4 * hidden_dim), bound),
        "w_hh": uni(kwh, (hidden_dim, 4 * hidden_dim), bound),
        "b_ih": uni(kbi, (4 * hidden_dim,), bound),
        "b_hh": uni(kbh, (4 * hidden_dim,), bound),
        "w_lin": uni(kwl, (hidden_dim, output_dim), bound),
        "b_lin": uni(kbl, (output_dim,), bound),
    }

    out = lstm_decoder_forward(encoded, seq_lens, params)
    out = jax.block_until_ready(out)

    ref = _reference_forward(encoded, seq_lens, params)
    assert out.shape == (total, output_dim), out.shape
    err = float(jnp.max(jnp.abs(out - ref)))
    assert err < 1e-3, f"mismatch vs reference: {err}"

    print("KERNEL_OK")
</pallas_src>

<mosaic_0001>
module attributes {stable_mosaic.version = 11 : i64} {
  func.func @_lstm_decoder_kernel(%arg0: memref<64x64xf32, #tpu.memory_space<vmem>>, %arg1: memref<64x128xf32, #tpu.memory_space<vmem>>, %arg2: memref<1x128xf32, #tpu.memory_space<vmem>>, %arg3: memref<32x128xf32, #tpu.memory_space<vmem>>, %arg4: memref<32x32xf32, #tpu.memory_space<vmem>>, %arg5: memref<1x32xf32, #tpu.memory_space<vmem>>, %arg6: memref<64x32xf32, #tpu.memory_space<vmem>>, %arg7: memref<64x32xf32, #tpu.memory_space<vmem>>) attributes {dimension_semantics = [], scalar_prefetch = 0 : i64, scratch_operands = 1 : i64, tpu.core_type = #tpu.core_type<tc>} {
    %c0 = arith.constant 0 : index
    %c0_0 = arith.constant 0 : index
    %0 = vector.load %arg0[%c0, %c0_0] : memref<64x64xf32, #tpu.memory_space<vmem>>, vector<64x64xf32>
    %c0_1 = arith.constant 0 : index
    %c0_2 = arith.constant 0 : index
    %1 = vector.load %arg1[%c0_1, %c0_2] : memref<64x128xf32, #tpu.memory_space<vmem>>, vector<64x128xf32>
    %cst = arith.constant dense<0.000000e+00> : vector<64x128xf32>
    %2 = tpu.matmul %0, %1, %cst {dimension_numbers = #tpu.dot_dimension_numbers<[1], [0], [0], [1], [0, 0, 1, 1], [], []>} : vector<64x64xf32>, vector<64x128xf32>, vector<64x128xf32> -> vector<64x128xf32>
    %c0_3 = arith.constant 0 : index
    %c0_4 = arith.constant 0 : index
    %3 = vector.load %arg2[%c0_3, %c0_4] : memref<1x128xf32, #tpu.memory_space<vmem>>, vector<1x128xf32>
    %4 = vector.broadcast %3 : vector<1x128xf32> to vector<64x128xf32>
    %5 = arith.addf %2, %4 : vector<64x128xf32>
    %c0_5 = arith.constant 0 : index
    %c0_6 = arith.constant 0 : index
    %6 = vector.load %arg3[%c0_5, %c0_6] : memref<32x128xf32, #tpu.memory_space<vmem>>, vector<32x128xf32>
    %cst_7 = arith.constant 0.000000e+00 : f32
    %7 = vector.broadcast %cst_7 : f32 to vector<8x32xf32>
    %cst_8 = arith.constant 0.000000e+00 : f32
    %8 = vector.broadcast %cst_8 : f32 to vector<8x32xf32>
    %9 = vector.extract_strided_slice %5 {offsets = [0, 0], sizes = [8, 128], strides = [1, 1]} : vector<64x128xf32> to vector<8x128xf32>
    %cst_9 = arith.constant dense<0.000000e+00> : vector<8x128xf32>
    %10 = tpu.matmul %7, %6, %cst_9 {dimension_numbers = #tpu.dot_dimension_numbers<[1], [0], [0], [1], [0, 0, 1, 1], [], []>} : vector<8x32xf32>, vector<32x128xf32>, vector<8x128xf32> -> vector<8x128xf32>
    %11 = arith.addf %9, %10 : vector<8x128xf32>
    %12 = arith.negf %11 : vector<8x128xf32>
    %13 = math.exp %12 : vector<8x128xf32>
    %cst_10 = arith.constant 1.000000e+00 : f32
    %14 = vector.broadcast %cst_10 : f32 to vector<8x128xf32>
    %15 = arith.addf %14, %13 : vector<8x128xf32>
    %16 = arith.divf %14, %15 : vector<8x128xf32>
    %17 = math.tanh %11 : vector<8x128xf32>
    %18 = vector.extract_strided_slice %16 {offsets = [0, 0], sizes = [8, 32], strides = [1, 1]} : vector<8x128xf32> to vector<8x32xf32>
    %19 = vector.extract_strided_slice %16 {offsets = [0, 32], sizes = [8, 32], strides = [1, 1]} : vector<8x128xf32> to vector<8x32xf32>
    %20 = vector.extract_strided_slice %17 {offsets = [0, 64], sizes = [8, 32], strides = [1, 1]} : vector<8x128xf32> to vector<8x32xf32>
    %21 = vector.extract_strided_slice %16 {offsets = [0, 96], sizes = [8, 32], strides = [1, 1]} : vector<8x128xf32> to vector<8x32xf32>
    %22 = arith.mulf %19, %8 : vector<8x32xf32>
    %23 = arith.mulf %18, %20 : vector<8x32xf32>
    %24 = arith.addf %22, %23 : vector<8x32xf32>
    %25 = math.tanh %24 : vector<8x32xf32>
    %26 = arith.mulf %21, %25 : vector<8x32xf32>
    %c0_11 = arith.constant 0 : index
    %c0_12 = arith.constant 0 : index
    %27 = vector.load %arg7[%c0_11, %c0_12] : memref<64x32xf32, #tpu.memory_space<vmem>>, vector<8x32xf32>
    tpu.vector_store %arg7[%c0_11, %c0_12], %26 {strides = array<i32>} : memref<64x32xf32, #tpu.memory_space<vmem>>, vector<8x32xf32>,
    %28 = vector.extract_strided_slice %5 {offsets = [8, 0], sizes = [8, 128], strides = [1, 1]} : vector<64x128xf32> to vector<8x128xf32>
    %cst_13 = arith.constant dense<0.000000e+00> : vector<8x128xf32>
    %29 = tpu.matmul %26, %6, %cst_13 {dimension_numbers = #tpu.dot_dimension_numbers<[1], [0], [0], [1], [0, 0, 1, 1], [], []>} : vector<8x32xf32>, vector<32x128xf32>, vector<8x128xf32> -> vector<8x128xf32>
    %30 = arith.addf %28, %29 : vector<8x128xf32>
    %31 = arith.negf %30 : vector<8x128xf32>
    %32 = math.exp %31 : vector<8x128xf32>
    %cst_14 = arith.constant 1.000000e+00 : f32
    %33 = vector.broadcast %cst_14 : f32 to vector<8x128xf32>
    %34 = arith.addf %33, %32 : vector<8x128xf32>
    %35 = arith.divf %33, %34 : vector<8x128xf32>
    %36 = math.tanh %30 : vector<8x128xf32>
    %37 = vector.extract_strided_slice %35 {offsets = [0, 0], sizes = [8, 32], strides = [1, 1]} : vector<8x128xf32> to vector<8x32xf32>
    %38 = vector.extract_strided_slice %35 {offsets = [0, 32], sizes = [8, 32], strides = [1, 1]} : vector<8x128xf32> to vector<8x32xf32>
    %39 = vector.extract_strided_slice %36 {offsets = [0, 64], sizes = [8, 32], strides = [1, 1]} : vector<8x128xf32> to vector<8x32xf32>
    %40 = vector.extract_strided_slice %35 {offsets = [0, 96], sizes = [8, 32], strides = [1, 1]} : vector<8x128xf32> to vector<8x32xf32>
    %41 = arith.mulf %38, %24 : vector<8x32xf32>
    %42 = arith.mulf %37, %39 : vector<8x32xf32>
    %43 = arith.addf %41, %42 : vector<8x32xf32>
    %44 = math.tanh %43 : vector<8x32xf32>
    %45 = arith.mulf %40, %44 : vector<8x32xf32>
    %c8 = arith.constant 8 : index
    %c0_15 = arith.constant 0 : index
    %46 = vector.load %arg7[%c8, %c0_15] : memref<64x32xf32, #tpu.memory_space<vmem>>, vector<8x32xf32>
    tpu.vector_store %arg7[%c8, %c0_15], %45 {strides = array<i32>} : memref<64x32xf32, #tpu.memory_space<vmem>>, vector<8x32xf32>,
    %47 = vector.extract_strided_slice %5 {offsets = [16, 0], sizes = [8, 128], strides = [1, 1]} : vector<64x128xf32> to vector<8x128xf32>
    %cst_16 = arith.constant dense<0.000000e+00> : vector<8x128xf32>
    %48 = tpu.matmul %45, %6, %cst_16 {dimension_numbers = #tpu.dot_dimension_numbers<[1], [0], [0], [1], [0, 0, 1, 1], [], []>} : vector<8x32xf32>, vector<32x128xf32>, vector<8x128xf32> -> vector<8x128xf32>
    %49 = arith.addf %47, %48 : vector<8x128xf32>
    %50 = arith.negf %49 : vector<8x128xf32>
    %51 = math.exp %50 : vector<8x128xf32>
    %cst_17 = arith.constant 1.000000e+00 : f32
    %52 = vector.broadcast %cst_17 : f32 to vector<8x128xf32>
    %53 = arith.addf %52, %51 : vector<8x128xf32>
    %54 = arith.divf %52, %53 : vector<8x128xf32>
    %55 = math.tanh %49 : vector<8x128xf32>
    %56 = vector.extract_strided_slice %54 {offsets = [0, 0], sizes = [8, 32], strides = [1, 1]} : vector<8x128xf32> to vector<8x32xf32>
    %57 = vector.extract_strided_slice %54 {offsets = [0, 32], sizes = [8, 32], strides = [1, 1]} : vector<8x128xf32> to vector<8x32xf32>
    %58 = vector.extract_strided_slice %55 {offsets = [0, 64], sizes = [8, 32], strides = [1, 1]} : vector<8x128xf32> to vector<8x32xf32>
    %59 = vector.extract_strided_slice %54 {offsets = [0, 96], sizes = [8, 32], strides = [1, 1]} : vector<8x128xf32> to vector<8x32xf32>
    %60 = arith.mulf %57, %43 : vector<8x32xf32>
    %61 = arith.mulf %56, %58 : vector<8x32xf32>
    %62 = arith.addf %60, %61 : vector<8x32xf32>
    %63 = math.tanh %62 : vector<8x32xf32>
    %64 = arith.mulf %59, %63 : vector<8x32xf32>
    %c16 = arith.constant 16 : index
    %c0_18 = arith.constant 0 : index
    %65 = vector.load %arg7[%c16, %c0_18] : memref<64x32xf32, #tpu.memory_space<vmem>>, vector<8x32xf32>
    tpu.vector_store %arg7[%c16, %c0_18], %64 {strides = array<i32>} : memref<64x32xf32, #tpu.memory_space<vmem>>, vector<8x32xf32>,
    %66 = vector.extract_strided_slice %5 {offsets = [24, 0], sizes = [8, 128], strides = [1, 1]} : vector<64x128xf32> to vector<8x128xf32>
    %cst_19 = arith.constant dense<0.000000e+00> : vector<8x128xf32>
    %67 = tpu.matmul %64, %6, %cst_19 {dimension_numbers = #tpu.dot_dimension_numbers<[1], [0], [0], [1], [0, 0, 1, 1], [], []>} : vector<8x32xf32>, vector<32x128xf32>, vector<8x128xf32> -> vector<8x128xf32>
    %68 = arith.addf %66, %67 : vector<8x128xf32>
    %69 = arith.negf %68 : vector<8x128xf32>
    %70 = math.exp %69 : vector<8x128xf32>
    %cst_20 = arith.constant 1.000000e+00 : f32
    %71 = vector.broadcast %cst_20 : f32 to vector<8x128xf32>
    %72 = arith.addf %71, %70 : vector<8x128xf32>
    %73 = arith.divf %71, %72 : vector<8x128xf32>
    %74 = math.tanh %68 : vector<8x128xf32>
    %75 = vector.extract_strided_slice %73 {offsets = [0, 0], sizes = [8, 32], strides = [1, 1]} : vector<8x128xf32> to vector<8x32xf32>
    %76 = vector.extract_strided_slice %73 {offsets = [0, 32], sizes = [8, 32], strides = [1, 1]} : vector<8x128xf32> to vector<8x32xf32>
    %77 = vector.extract_strided_slice %74 {offsets = [0, 64], sizes = [8, 32], strides = [1, 1]} : vector<8x128xf32> to vector<8x32xf32>
    %78 = vector.extract_strided_slice %73 {offsets = [0, 96], sizes = [8, 32], strides = [1, 1]} : vector<8x128xf32> to vector<8x32xf32>
    %79 = arith.mulf %76, %62 : vector<8x32xf32>
    %80 = arith.mulf %75, %77 : vector<8x32xf32>
    %81 = arith.addf %79, %80 : vector<8x32xf32>
    %82 = math.tanh %81 : vector<8x32xf32>
    %83 = arith.mulf %78, %82 : vector<8x32xf32>
    %c24 = arith.constant 24 : index
    %c0_21 = arith.constant 0 : index
    %84 = vector.load %arg7[%c24, %c0_21] : memref<64x32xf32, #tpu.memory_space<vmem>>, vector<8x32xf32>
    tpu.vector_store %arg7[%c24, %c0_21], %83 {strides = array<i32>} : memref<64x32xf32, #tpu.memory_space<vmem>>, vector<8x32xf32>,
    %85 = vector.extract_strided_slice %5 {offsets = [32, 0], sizes = [8, 128], strides = [1, 1]} : vector<64x128xf32> to vector<8x128xf32>
    %cst_22 = arith.constant dense<0.000000e+00> : vector<8x128xf32>
    %86 = tpu.matmul %83, %6, %cst_22 {dimension_numbers = #tpu.dot_dimension_numbers<[1], [0], [0], [1], [0, 0, 1, 1], [], []>} : vector<8x32xf32>, vector<32x128xf32>, vector<8x128xf32> -> vector<8x128xf32>
    %87 = arith.addf %85, %86 : vector<8x128xf32>
    %88 = arith.negf %87 : vector<8x128xf32>
    %89 = math.exp %88 : vector<8x128xf32>
    %cst_23 = arith.constant 1.000000e+00 : f32
    %90 = vector.broadcast %cst_23 : f32 to vector<8x128xf32>
    %91 = arith.addf %90, %89 : vector<8x128xf32>
    %92 = arith.divf %90, %91 : vector<8x128xf32>
    %93 = math.tanh %87 : vector<8x128xf32>
    %94 = vector.extract_strided_slice %92 {offsets = [0, 0], sizes = [8, 32], strides = [1, 1]} : vector<8x128xf32> to vector<8x32xf32>
    %95 = vector.extract_strided_slice %92 {offsets = [0, 32], sizes = [8, 32], strides = [1, 1]} : vector<8x128xf32> to vector<8x32xf32>
    %96 = vector.extract_strided_slice %93 {offsets = [0, 64], sizes = [8, 32], strides = [1, 1]} : vector<8x128xf32> to vector<8x32xf32>
    %97 = vector.extract_strided_slice %92 {offsets = [0, 96], sizes = [8, 32], strides = [1, 1]} : vector<8x128xf32> to vector<8x32xf32>
    %98 = arith.mulf %95, %81 : vector<8x32xf32>
    %99 = arith.mulf %94, %96 : vector<8x32xf32>
    %100 = arith.addf %98, %99 : vector<8x32xf32>
    %101 = math.tanh %100 : vector<8x32xf32>
    %102 = arith.mulf %97, %101 : vector<8x32xf32>
    %c32 = arith.constant 32 : index
    %c0_24 = arith.constant 0 : index
    %103 = vector.load %arg7[%c32, %c0_24] : memref<64x32xf32, #tpu.memory_space<vmem>>, vector<8x32xf32>
    tpu.vector_store %arg7[%c32, %c0_24], %102 {strides = array<i32>} : memref<64x32xf32, #tpu.memory_space<vmem>>, vector<8x32xf32>,
    %104 = vector.extract_strided_slice %5 {offsets = [40, 0], sizes = [8, 128], strides = [1, 1]} : vector<64x128xf32> to vector<8x128xf32>
    %cst_25 = arith.constant dense<0.000000e+00> : vector<8x128xf32>
    %105 = tpu.matmul %102, %6, %cst_25 {dimension_numbers = #tpu.dot_dimension_numbers<[1], [0], [0], [1], [0, 0, 1, 1], [], []>} : vector<8x32xf32>, vector<32x128xf32>, vector<8x128xf32> -> vector<8x128xf32>
    %106 = arith.addf %104, %105 : vector<8x128xf32>
    %107 = arith.negf %106 : vector<8x128xf32>
    %108 = math.exp %107 : vector<8x128xf32>
    %cst_26 = arith.constant 1.000000e+00 : f32
    %109 = vector.broadcast %cst_26 : f32 to vector<8x128xf32>
    %110 = arith.addf %109, %108 : vector<8x128xf32>
    %111 = arith.divf %109, %110 : vector<8x128xf32>
    %112 = math.tanh %106 : vector<8x128xf32>
    %113 = vector.extract_strided_slice %111 {offsets = [0, 0], sizes = [8, 32], strides = [1, 1]} : vector<8x128xf32> to vector<8x32xf32>
    %114 = vector.extract_strided_slice %111 {offsets = [0, 32], sizes = [8, 32], strides = [1, 1]} : vector<8x128xf32> to vector<8x32xf32>
    %115 = vector.extract_strided_slice %112 {offsets = [0, 64], sizes = [8, 32], strides = [1, 1]} : vector<8x128xf32> to vector<8x32xf32>
    %116 = vector.extract_strided_slice %111 {offsets = [0, 96], sizes = [8, 32], strides = [1, 1]} : vector<8x128xf32> to vector<8x32xf32>
    %117 = arith.mulf %114, %100 : vector<8x32xf32>
    %118 = arith.mulf %113, %115 : vector<8x32xf32>
    %119 = arith.addf %117, %118 : vector<8x32xf32>
    %120 = math.tanh %119 : vector<8x32xf32>
    %121 = arith.mulf %116, %120 : vector<8x32xf32>
    %c40 = arith.constant 40 : index
    %c0_27 = arith.constant 0 : index
    %122 = vector.load %arg7[%c40, %c0_27] : memref<64x32xf32, #tpu.memory_space<vmem>>, vector<8x32xf32>
    tpu.vector_store %arg7[%c40, %c0_27], %121 {strides = array<i32>} : memref<64x32xf32, #tpu.memory_space<vmem>>, vector<8x32xf32>,
    %123 = vector.extract_strided_slice %5 {offsets = [48, 0], sizes = [8, 128], strides = [1, 1]} : vector<64x128xf32> to vector<8x128xf32>
    %cst_28 = arith.constant dense<0.000000e+00> : vector<8x128xf32>
    %124 = tpu.matmul %121, %6, %cst_28 {dimension_numbers = #tpu.dot_dimension_numbers<[1], [0], [0], [1], [0, 0, 1, 1], [], []>} : vector<8x32xf32>, vector<32x128xf32>, vector<8x128xf32> -> vector<8x128xf32>
    %125 = arith.addf %123, %124 : vector<8x128xf32>
    %126 = arith.negf %125 : vector<8x128xf32>
    %127 = math.exp %126 : vector<8x128xf32>
    %cst_29 = arith.constant 1.000000e+00 : f32
    %128 = vector.broadcast %cst_29 : f32 to vector<8x128xf32>
    %129 = arith.addf %128, %127 : vector<8x128xf32>
    %130 = arith.divf %128, %129 : vector<8x128xf32>
    %131 = math.tanh %125 : vector<8x128xf32>
    %132 = vector.extract_strided_slice %130 {offsets = [0, 0], sizes = [8, 32], strides = [1, 1]} : vector<8x128xf32> to vector<8x32xf32>
    %133 = vector.extract_strided_slice %130 {offsets = [0, 32], sizes = [8, 32], strides = [1, 1]} : vector<8x128xf32> to vector<8x32xf32>
    %134 = vector.extract_strided_slice %131 {offsets = [0, 64], sizes = [8, 32], strides = [1, 1]} : vector<8x128xf32> to vector<8x32xf32>
    %135 = vector.extract_strided_slice %130 {offsets = [0, 96], sizes = [8, 32], strides = [1, 1]} : vector<8x128xf32> to vector<8x32xf32>
    %136 = arith.mulf %133, %119 : vector<8x32xf32>
    %137 = arith.mulf %132, %134 : vector<8x32xf32>
    %138 = arith.addf %136, %137 : vector<8x32xf32>
    %139 = math.tanh %138 : vector<8x32xf32>
    %140 = arith.mulf %135, %139 : vector<8x32xf32>
    %c48 = arith.constant 48 : index
    %c0_30 = arith.constant 0 : index
    %141 = vector.load %arg7[%c48, %c0_30] : memref<64x32xf32, #tpu.memory_space<vmem>>, vector<8x32xf32>
    tpu.vector_store %arg7[%c48, %c0_30], %140 {strides = array<i32>} : memref<64x32xf32, #tpu.memory_space<vmem>>, vector<8x32xf32>,
    %142 = vector.extract_strided_slice %5 {offsets = [56, 0], sizes = [8, 128], strides = [1, 1]} : vector<64x128xf32> to vector<8x128xf32>
    %cst_31 = arith.constant dense<0.000000e+00> : vector<8x128xf32>
    %143 = tpu.matmul %140, %6, %cst_31 {dimension_numbers = #tpu.dot_dimension_numbers<[1], [0], [0], [1], [0, 0, 1, 1], [], []>} : vector<8x32xf32>, vector<32x128xf32>, vector<8x128xf32> -> vector<8x128xf32>
    %144 = arith.addf %142, %143 : vector<8x128xf32>
    %145 = arith.negf %144 : vector<8x128xf32>
    %146 = math.exp %145 : vector<8x128xf32>
    %cst_32 = arith.constant 1.000000e+00 : f32
    %147 = vector.broadcast %cst_32 : f32 to vector<8x128xf32>
    %148 = arith.addf %147, %146 : vector<8x128xf32>
    %149 = arith.divf %147, %148 : vector<8x128xf32>
    %150 = math.tanh %144 : vector<8x128xf32>
    %151 = vector.extract_strided_slice %149 {offsets = [0, 0], sizes = [8, 32], strides = [1, 1]} : vector<8x128xf32> to vector<8x32xf32>
    %152 = vector.extract_strided_slice %149 {offsets = [0, 32], sizes = [8, 32], strides = [1, 1]} : vector<8x128xf32> to vector<8x32xf32>
    %153 = vector.extract_strided_slice %150 {offsets = [0, 64], sizes = [8, 32], strides = [1, 1]} : vector<8x128xf32> to vector<8x32xf32>
    %154 = vector.extract_strided_slice %149 {offsets = [0, 96], sizes = [8, 32], strides = [1, 1]} : vector<8x128xf32> to vector<8x32xf32>
    %155 = arith.mulf %152, %138 : vector<8x32xf32>
    %156 = arith.mulf %151, %153 : vector<8x32xf32>
    %157 = arith.addf %155, %156 : vector<8x32xf32>
    %158 = math.tanh %157 : vector<8x32xf32>
    %159 = arith.mulf %154, %158 : vector<8x32xf32>
    %c56 = arith.constant 56 : index
    %c0_33 = arith.constant 0 : index
    %160 = vector.load %arg7[%c56, %c0_33] : memref<64x32xf32, #tpu.memory_space<vmem>>, vector<8x32xf32>
    tpu.vector_store %arg7[%c56, %c0_33], %159 {strides = array<i32>} : memref<64x32xf32, #tpu.memory_space<vmem>>, vector<8x32xf32>,
    %c0_34 = arith.constant 0 : index
    %c0_35 = arith.constant 0 : index
    %161 = vector.load %arg7[%c0_34, %c0_35] : memref<64x32xf32, #tpu.memory_space<vmem>>, vector<64x32xf32>
    %c0_36 = arith.constant 0 : index
    %c0_37 = arith.constant 0 : index
    %162 = vector.load %arg4[%c0_36, %c0_37] : memref<32x32xf32, #tpu.memory_space<vmem>>, vector<32x32xf32>
    %cst_38 = arith.constant dense<0.000000e+00> : vector<64x32xf32>
    %163 = tpu.matmul %161, %162, %cst_38 {dimension_numbers = #tpu.dot_dimension_numbers<[1], [0], [0], [1], [0, 0, 1, 1], [], []>} : vector<64x32xf32>, vector<32x32xf32>, vector<64x32xf32> -> vector<64x32xf32>
    %c0_39 = arith.constant 0 : index
    %c0_40 = arith.constant 0 : index
    %164 = vector.load %arg5[%c0_39, %c0_40] : memref<1x32xf32, #tpu.memory_space<vmem>>, vector<1x32xf32>
    %165 = vector.broadcast %164 : vector<1x32xf32> to vector<64x32xf32>
    %166 = arith.addf %163, %165 : vector<64x32xf32>
    %c0_41 = arith.constant 0 : index
    %c0_42 = arith.constant 0 : index
    %167 = vector.load %arg6[%c0_41, %c0_42] : memref<64x32xf32, #tpu.memory_space<vmem>>, vector<64x32xf32>
    tpu.vector_store %arg6[%c0_41, %c0_42], %166 {strides = array<i32>} : memref<64x32xf32, #tpu.memory_space<vmem>>, vector<64x32xf32>,
    return
  }
}

</mosaic_0001>

<bundles_post_ra>
// kernel: tpu_custom_call.1
= control target key start
LH: loop header
LB: loop body
LE: loop exit
PB: predicated region body
PF: predicated region fallthrough
CT: control target
= control target key end

     0   :  { %11 = vsyncpa [#allocation4], 0  ;;  %s1241_s0 = inlined_call_operand.hbm [shape: f32[64,64], index: 0, kind: input, shape index: {}]   ;;  %s1242_s1 = inlined_call_operand.hbm [shape: f32[64,128], index: 1, kind: input, shape index: {}]   ;;  %s1243_s2 = inlined_call_operand.vmem [shape: f32[1,128], index: 2, kind: input, shape index: {}]   ;;  %s1244_s3 = inlined_call_operand.hbm [shape: f32[32,128], index: 3, kind: input, shape index: {}]   ;;  %s1245_s4 = inlined_call_operand.hbm [shape: f32[32,32], index: 4, kind: input, shape index: {}]   ;;  %s1246_s5 = inlined_call_operand.vmem [shape: f32[1,32], index: 5, kind: input, shape index: {}]   ;;  %s1247_s6 = inlined_call_operand.vmem [shape: f32[64,32], index: 6, kind: output, shape index: {}]  }
   0x1   :  { %12 = vsyncpa [#allocation6], 0 }
   0x2   :  { %13 = vsyncpa [#allocation9], 0  ;;  %s31_s23 = sshll.u32 %s1242_s1, 4  ;;  %s1014_s24 = smov [#allocation5]   ;;  %s32_s23 = int_to_ptr.hbm [resolvable:$true] %s31_s23 }
   0x3   :  { %s33_s25 = sshll.u32 %s1014_s24, 4  ;;  %s18_s28 = sshll.u32 %s1241_s0, 4  ;;  %s34_s25 = int_to_ptr.vmem [resolvable:$true] %s33_s25  ;;  %s19_s28 = int_to_ptr.hbm [resolvable:$true] %s18_s28 }
   0x4   :  { %s1015_s29 = smov 128   ;;  %s1016_s30 = smov 8  }
   0x5   :  { %39 = dma.hbm_to_vmem [thread:$0]  %s32_s23, 1024, %s34_s25, [#allocation6], %s1015_s29, %s1015_s29, %s1016_s30  }
   0x6   :  { %s1017_s7 = smov [#allocation3]   ;;  %s46_s11 = sshll.u32 %s1244_s3, 4  ;;  %s47_s11 = int_to_ptr.hbm [resolvable:$true] %s46_s11 }
   0x7   :  { %s20_s8 = sshll.u32 %s1017_s7, 4  ;;  %s59_s13 = sshll.u32 %s1245_s4, 4  ;;  %s21_s8 = int_to_ptr.vmem [resolvable:$true] %s20_s8  ;;  %s60_s13 = int_to_ptr.hbm [resolvable:$true] %s59_s13 }
   0x8   :  { %26 = dma.hbm_to_vmem [thread:$0]  %s19_s28, 1024, %s21_s8, [#allocation4], %s1015_s29, %s1015_s29, %s1016_s30  }
   0x9   :  { %s1018_s14 = smov [#allocation7]   ;;  %s1019_s0 = smov [#allocation8]  }
   0xa   :  { %s48_s15 = sshll.u32 %s1018_s14, 4  ;;  %s61_s16 = sshll.u32 %s1019_s0, 4  ;;  %s49_s15 = int_to_ptr.vmem [resolvable:$true] %s48_s15  ;;  %s62_s16 = int_to_ptr.vmem [resolvable:$true] %s61_s16 }
   0xb   :  { %54 = dma.hbm_to_vmem [thread:$0]  %s47_s11, 512, %s49_s15, [#allocation6], %s1015_s29, %s1015_s29, %s1016_s30  }
   0xc   :  { %67 = dma.hbm_to_vmem [thread:$0]  %s60_s13, 512, %s62_s16, [#allocation9], %s1015_s29, %s1015_s29, %s1016_s30  }
   0xd   :  { %1008 = dma.done.wait [#allocation4], 1024  }
   0xe   :  { %1009 = vsyncadd [#allocation4], 4294966272 }
   0xf   :  { %1010 = dma.done.wait [#allocation6], 1536  }
  0x10   :  { %1011 = vsyncadd [#allocation6], 4294965760 }
  0x11   :  { %1012 = dma.done.wait [#allocation9], 512  }
  0x12   :  { %1013 = vsyncadd [#allocation9], 4294966784  ;;  %v101_v0 = vld [vmem:[#allocation5 + $0x38] sm:$0xff]  ;;  %v100_v1 = vld [vmem:[#allocation5 + $0x30] sm:$0xff]  ;;  %v1020_v11 = vmov 0.0   ;;  %vm106_vm0 = vcmask 523264  }
  0x13   :  { %139 = vmatpush.msra.mxu0 %v101_v0  ;;  %825 = vmatpush.msra.mxu2 %v101_v0  ;;  %v99_v2 = vld [vmem:[#allocation5 + $0x28] sm:$0xff]  ;;  %v1070_v3 = vld [vmem:[#allocation7 + $0x18] sm:$0xff]  ;;  %v1072_v4 = vld [vmem:[#allocation7 + $0x10] sm:$0xff]  ;;  %s1021_s17 = smov 64   ;;  %vm176_vm5 = vcmask 261120  }
  0x14   :  { %192 = vmatpush.msra.mxu1 %v1070_v3  ;;  %v98_v5 = vld [vmem:[#allocation5 + $0x20] sm:$0xff]  ;;  %v1075_v6 = vld [vmem:[#allocation7 + $0x8] sm:$0xff]  ;;  %322 = vmatpush.msra.mxu3 %v1070_v3  ;;  %v97_v7 = vld [vmem:[#allocation5 + $0x18] sm:$0xff] }
  0x15   :  { %140 = vmatpush.msra.mxu0 %v100_v1  ;;  %826 = vmatpush.msra.mxu2 %v100_v1  ;;  %v1079_v8 = vld [vmem:[#allocation7] sm:$0xff]  ;;  %v96_v9 = vld [vmem:[#allocation5 + $0x10] sm:$0xff]  ;;  %v95_v10 = vld [vmem:[#allocation5 + $0x8] sm:$0xff] }
  0x16   :  { %193 = vmatpush.msra.mxu1 %v1072_v4  ;;  %323 = vmatpush.msra.mxu3 %v1072_v4  ;;  %v94_v12 = vld [vmem:[#allocation5] sm:$0xff]  ;;  %v92_v39 = vld [vmem:[#allocation3 + $0x30] sm:$0xff]  ;;  %v93_v40 = vld [vmem:[#allocation3 + $0x38] sm:$0xff] }
  0x17   :  { %141 = vmatpush.msra.mxu0 %v99_v2  ;;  %827 = vmatpush.msra.mxu2 %v99_v2  ;;  %v86_v13 = vld [vmem:[#allocation3] sm:$0xff]  ;;  %v87_v43 = vld [vmem:[#allocation3 + $0x8] sm:$0xff] }
  0x18   :  { %194 = vmatpush.msra.mxu1 %v1075_v6  ;;  %324 = vmatpush.msra.mxu3 %v1075_v6  ;;  %v1106_v14 = vld [vmem:[%s1243_s2] ss:$0 sm:$0xff]  ;;  %s1022_s2 = smov 32  }
  0x19   :  { %142 = vmatpush.msra.mxu0 %v98_v5  ;;  %828 = vmatpush.msra.mxu2 %v98_v5 }
  0x1a   :  { %195 = vmatpush.msra.mxu1 %v1079_v8  ;;  %325 = vmatpush.msra.mxu3 %v1079_v8 }
  0x1b   :  { %143 = vmatpush.msra.mxu0 %v97_v7  ;;  %196 = vmatmul.f32.vlgmr.msra.gmra.mxu1 %v1020_v11 }
  0x1c   :  { %829 = vmatpush.msra.mxu2 %v97_v7  ;;  %387 = vmatpush.msrb.mxu1 %v1070_v3 }
  0x1d   :  { %144 = vmatpush.msra.mxu0 %v96_v9  ;;  %517 = vmatpush.msrb.mxu3 %v1070_v3 }
  0x1e   :  { %830 = vmatpush.msra.mxu2 %v96_v9  ;;  %388 = vmatpush.msrb.mxu1 %v1072_v4  ;;  %v88_v9 = vld [vmem:[#allocation3 + $0x10] sm:$0xff] }
  0x1f   :  { %145 = vmatpush.msra.mxu0 %v95_v10  ;;  %518 = vmatpush.msrb.mxu3 %v1072_v4 }
  0x20   :  { %831 = vmatpush.msra.mxu2 %v95_v10  ;;  %389 = vmatpush.msrb.mxu1 %v1075_v6 }
  0x21   :  { %146 = vmatpush.msra.mxu0 %v94_v12  ;;  %519 = vmatpush.msrb.mxu3 %v1075_v6 }
  0x22   :  { %794 = vmatmul.msk.f32.vlgmr.msra.gmra.mxu0 %vm106_vm0, %v86_v13  ;;  %832 = vmatpush.msra.mxu2 %v94_v12 }
  0x23   :  { %390 = vmatpush.msrb.mxu1 %v1079_v8  ;;  %520 = vmatpush.msrb.mxu3 %v1079_v8 }
  0x24   :  { %257 = vmatpush.msrb.mxu2 %v1070_v3 }
  0x25   :  { %582 = vmatpush.msra.mxu1 %v1070_v3  ;;  %800 = vmatmul.msk.f32.vlgmr.msra.gmra.mxu2 %vm106_vm0, %v92_v39 }
  0x26   :  { %258 = vmatpush.msrb.mxu2 %v1072_v4 }
  0x27   :  { %583 = vmatpush.msra.mxu1 %v1072_v4 }
  0x28   :  { %259 = vmatpush.msrb.mxu2 %v1075_v6 }
  0x29   :  { %584 = vmatpush.msra.mxu1 %v1075_v6 }
  0x2a   :  { %260 = vmatpush.msrb.mxu2 %v1079_v8  ;;  %795 = vmatmul.msk.f32.gmra.mxu0 %vm106_vm0, %v87_v43 }
  0x2b   :  { %585 = vmatpush.msra.mxu1 %v1079_v8 }
  0x2c   :  { %452 = vmatpush.msra.mxu2 %v1070_v3 }
  0x2d   :  { %801 = vmatmul.msk.f32.gmra.mxu2 %vm106_vm0, %v93_v40 }
  0x2e   :  { %453 = vmatpush.msra.mxu2 %v1072_v4 }
  0x30   :  { %454 = vmatpush.msra.mxu2 %v1075_v6 }
  0x32   :  { %455 = vmatpush.msra.mxu2 %v1079_v8  ;;  %796 = vmatmul.msk.f32.gmra.mxu0 %vm106_vm0, %v88_v9 }
  0x98   :  { %v197_v16 = vpop.f32.mrf.mxu1 }
  0x9f   :  { %v148_v15 = vpop.f32.mrf.mxu0 }
  0xa0   :  { %v149_v17 = vadd.f32 %v1106_v14, %v148_v15 }
  0xa2   :  { %v200_v18 = vadd.f32 %v197_v16, %v149_v17 }
  0xa4   :  { %848 = vtanh.f32 %v200_v18  ;;  %v802_v20 = vmul.f32 -1.442695, %v200_v18 }
  0xa6   :  { %850 = vpow2.f32 %v802_v20 }
  0xa7   :  { %v151_v47 = vpop.f32.mrf.mxu0 }
  0xa8   :  { %v1126_v45 = vpop.f32.mrf.mxu2  ;;  %v152_v48 = vadd.f32 %v1106_v14, %v151_v47 }
  0xaa   :  { %v849_v19 = vpop.eup %848 }
  0xab   :  { %223 = vrot.lane.b32.xlu0 %v849_v19, %s1021_s17 }
  0xac   :  { %v851_v21 = vpop.eup %850 }
  0xad   :  { %v204_v22 = vadd.f32 1.0, %v851_v21 }
  0xaf   :  { %852 = vrcp.f32 %v204_v22  ;;  %v216_v28 = vand.u32 2147483648, %v204_v22  ;;  %vm210_vm2 = vweird.f32 %v204_v22  ;;  %v214_v29 = vand.u32 2147483647, %v204_v22  ;;  %v154_v11 = vpop.f32.mrf.mxu0 }
  0xb0   :  { %v1128_v46 = vpop.f32.mrf.mxu2  ;;  %v155_v12 = vadd.f32 %v1106_v14, %v154_v11 }
  0xb1   :  { %v217_v31 = vor.u32 1.1754944e-38, %v216_v28  ;;  %vm215_vm4 = vcmp.eq.f32.partialorder %v214_v29, 8.507059e+37 }
  0xb5   :  { %v853_v23 = vpop.eup %852 }
  0xb6   :  { %v206_v24 = vmul.f32 %v853_v23, %v204_v22  ;;  %vm211_vm1 = vweird.f32 %v853_v23 }
  0xb7   :  { %vm212_vm3 = vmor %vm210_vm2, %vm211_vm1 }
  0xb8   :  { %v207_v25 = vsub.f32 1.0, %v206_v24 }
  0xba   :  { %v208_v26 = vmul.f32 %v853_v23, %v207_v25 }
  0xbc   :  { %v209_v27 = vadd.f32 %v853_v23, %v208_v26 }
  0xbe   :  { %v213_v30 = vsel %vm212_vm3, %v853_v23, %v209_v27 }
  0xbf   :  { %v218_v33 = vsel %vm215_vm4, %v217_v31, %v213_v30 }
  0xc0   :  { %v221_v35 = vmul.f32 0.0, %v218_v33 }
 0x11d   :  { %v224_v32 = vpop.permute.xlu0 %223 }
 0x11e   :  { %v226_v34 = vmul.f32 %v224_v32, %v218_v33 }
 0x120   :  { %228 = vrot.lane.b32.xlu0 %v226_v34, %s1022_s2 }
 0x192   :  { %v229_v36 = vpop.permute.xlu0 %228 }
 0x193   :  { %v231_v37 = vadd.f32 %v229_v36, %v221_v35  ;;  %v89_v36 = vld [vmem:[#allocation3 + $0x18] sm:$0xff] }
 0x194   :  { %797 = vmatmul.msk.f32.gmra.mxu0 %vm106_vm0, %v89_v36  ;;  %v707_v36 = vld [vmem:[#allocation8 + $0x8] sm:$0xff] }
 0x195   :  { %854 = vtanh.f32 %v231_v37 }
 0x19b   :  { %v855_v38 = vpop.eup %854 }
 0x19c   :  { %234 = vrot.lane.b32.xlu1 %v855_v38, %s1021_s17 }
 0x20e   :  { %v235_v41 = vpop.permute.xlu1 %234 }
 0x20f   :  { %v237_v42 = vmul.f32 %v235_v41, %v218_v33 }
 0x211   :  { %239 = vrot.lane.b32.xlu1 %v237_v42, %s1022_s2  ;;  %v157_v40 = vpop.f32.mrf.mxu0 }
 0x212   :  { %v158_v41 = vadd.f32 %v1106_v14, %v157_v40 }
 0x283   :  { %v240_v44 = vpop.permute.xlu1 %239 }
 0x284   :  { %242 = vst.msk [vmem:[#allocation2] sm:$0xff] %vm176_vm5, %v240_v44  ;;  %803 = vmatmul.msk.f32.vlgmr.msrb.gmra.mxu2 %vm176_vm5, %v240_v44 }
 0x285   :  { %647 = vmatpush.msrb.mxu2 %v1070_v3 }
 0x287   :  { %648 = vmatpush.msrb.mxu2 %v1072_v4 }
 0x289   :  { %649 = vmatpush.msrb.mxu2 %v1075_v6 }
 0x28b   :  { %650 = vmatpush.msrb.mxu2 %v1079_v8 }
 0x307   :  { %v262_v49 = vpop.f32.mrf.mxu2 }
 0x308   :  { %v265_v50 = vadd.f32 %v262_v49, %v152_v48 }
 0x30a   :  { %856 = vtanh.f32 %v265_v50  ;;  %v804_v52 = vmul.f32 -1.442695, %v265_v50 }
 0x30c   :  { %858 = vpow2.f32 %v804_v52 }
 0x310   :  { %v857_v51 = vpop.eup %856 }
 0x311   :  { %288 = vrot.lane.b32.xlu2 %v857_v51, %s1021_s17 }
 0x312   :  { %v859_v53 = vpop.eup %858 }
 0x313   :  { %v269_v54 = vadd.f32 1.0, %v859_v53 }
 0x315   :  { %860 = vrcp.f32 %v269_v54  ;;  %v281_v60 = vand.u32 2147483648, %v269_v54  ;;  %vm275_vm7 = vweird.f32 %v269_v54  ;;  %v279_v61 = vand.u32 2147483647, %v269_v54 }
 0x317   :  { %v282_v63 = vor.u32 1.1754944e-38, %v281_v60  ;;  %vm280_vm9 = vcmp.eq.f32.partialorder %v279_v61, 8.507059e+37 }
 0x31b   :  { %v861_v55 = vpop.eup %860 }
 0x31c   :  { %v271_v56 = vmul.f32 %v861_v55, %v269_v54  ;;  %vm276_vm6 = vweird.f32 %v861_v55 }
 0x31d   :  { %vm277_vm8 = vmor %vm275_vm7, %vm276_vm6 }
 0x31e   :  { %v272_v57 = vsub.f32 1.0, %v271_v56 }
 0x320   :  { %v273_v58 = vmul.f32 %v861_v55, %v272_v57 }
 0x322   :  { %v274_v59 = vadd.f32 %v861_v55, %v273_v58 }
 0x324   :  { %v278_v62 = vsel %vm277_vm8, %v861_v55, %v274_v59 }
 0x325   :  { %v283_v1 = vsel %vm280_vm9, %v282_v63, %v278_v62 }
 0x326   :  { %v286_v3 = vmul.f32 %v283_v1, %v231_v37 }
 0x36b   :  { %v289_v0 = vpop.permute.xlu2 %288 }
 0x36c   :  { %v291_v2 = vmul.f32 %v289_v0, %v283_v1 }
 0x36e   :  { %293 = vrot.lane.b32.xlu2 %v291_v2, %s1022_s2 }
 0x3c8   :  { %v294_v4 = vpop.permute.xlu2 %293 }
 0x3c9   :  { %v296_v5 = vadd.f32 %v294_v4, %v286_v3  ;;  %v90_v4 = vld [vmem:[#allocation3 + $0x20] sm:$0xff] }
 0x3ca   :  { %798 = vmatmul.msk.f32.gmra.mxu0 %vm106_vm0, %v90_v4 }
 0x3cb   :  { %862 = vtanh.f32 %v296_v5 }
 0x3d1   :  { %v863_v6 = vpop.eup %862 }
 0x3d2   :  { %299 = vrot.lane.b32.xlu0 %v863_v6, %s1021_s17 }
 0x444   :  { %v300_v7 = vpop.permute.xlu0 %299 }
 0x445   :  { %v302_v8 = vmul.f32 %v300_v7, %v283_v1 }
 0x447   :  { %304 = vrot.lane.b32.xlu1 %v302_v8, %s1022_s2  ;;  %v160_v6 = vpop.f32.mrf.mxu0 }
 0x448   :  { %v161_v7 = vadd.f32 %v1106_v14, %v160_v6 }
 0x4b9   :  { %v305_v10 = vpop.permute.xlu1 %304 }
 0x4ba   :  { %307 = vst.msk [vmem:[#allocation2 + $0x8] sm:$0xff] %vm176_vm5, %v305_v10  ;;  %805 = vmatmul.msk.f32.vlgmr.msra.gmra.mxu3 %vm176_vm5, %v305_v10 }
 0x53d   :  { %v327_v13 = vpop.f32.mrf.mxu3 }
 0x53e   :  { %v330_v15 = vadd.f32 %v327_v13, %v155_v12 }
 0x540   :  { %864 = vtanh.f32 %v330_v15  ;;  %v806_v17 = vmul.f32 -1.442695, %v330_v15 }
 0x542   :  { %866 = vpow2.f32 %v806_v17 }
 0x546   :  { %v865_v16 = vpop.eup %864 }
 0x547   :  { %353 = vrot.lane.b32.xlu2 %v865_v16, %s1021_s17 }
 0x548   :  { %v867_v18 = vpop.eup %866 }
 0x549   :  { %v334_v19 = vadd.f32 1.0, %v867_v18 }
 0x54b   :  { %868 = vrcp.f32 %v334_v19  ;;  %v346_v25 = vand.u32 2147483648, %v334_v19  ;;  %vm340_vm11 = vweird.f32 %v334_v19  ;;  %v344_v26 = vand.u32 2147483647, %v334_v19 }
 0x54d   :  { %v347_v28 = vor.u32 1.1754944e-38, %v346_v25  ;;  %vm345_vm13 = vcmp.eq.f32.partialorder %v344_v26, 8.507059e+37 }
 0x551   :  { %v869_v20 = vpop.eup %868 }
 0x552   :  { %v336_v21 = vmul.f32 %v869_v20, %v334_v19  ;;  %vm341_vm10 = vweird.f32 %v869_v20 }
 0x553   :  { %vm342_vm12 = vmor %vm340_vm11, %vm341_vm10 }
 0x554   :  { %v337_v22 = vsub.f32 1.0, %v336_v21 }
 0x556   :  { %v338_v23 = vmul.f32 %v869_v20, %v337_v22 }
 0x558   :  { %v339_v24 = vadd.f32 %v869_v20, %v338_v23 }
 0x55a   :  { %v343_v27 = vsel %vm342_vm12, %v869_v20, %v339_v24 }
 0x55b   :  { %v348_v30 = vsel %vm345_vm13, %v347_v28, %v343_v27 }
 0x55c   :  { %v351_v32 = vmul.f32 %v348_v30, %v296_v5 }
 0x5a1   :  { %v354_v29 = vpop.permute.xlu2 %353 }
 0x5a2   :  { %v356_v31 = vmul.f32 %v354_v29, %v348_v30 }
 0x5a4   :  { %358 = vrot.lane.b32.xlu0 %v356_v31, %s1022_s2 }
 0x616   :  { %v359_v33 = vpop.permute.xlu0 %358 }
 0x617   :  { %v361_v34 = vadd.f32 %v359_v33, %v351_v32  ;;  %v709_v33 = vld [vmem:[#allocation8 + $0x18] sm:$0xff] }
 0x618   :  { %833 = vmatpush.msra.mxu3 %v709_v33 }
 0x619   :  { %870 = vtanh.f32 %v361_v34 }
 0x61f   :  { %v871_v35 = vpop.eup %870 }
 0x620   :  { %364 = vrot.lane.b32.xlu1 %v871_v35, %s1021_s17  ;;  %v91_v35 = vld [vmem:[#allocation3 + $0x28] sm:$0xff] }
 0x621   :  { %799 = vmatmul.msk.f32.gmra.mxu0 %vm106_vm0, %v91_v35 }
 0x692   :  { %v365_v37 = vpop.permute.xlu1 %364 }
 0x693   :  { %v367_v38 = vmul.f32 %v365_v37, %v348_v30  ;;  %v706_v37 = vld [vmem:[#allocation8] sm:$0xff] }
 0x695   :  { %369 = vrot.lane.b32.xlu2 %v367_v38, %s1022_s2 }
 0x6ef   :  { %v370_v39 = vpop.permute.xlu2 %369 }
 0x6f0   :  { %372 = vst.msk [vmem:[#allocation2 + $0x10] sm:$0xff] %vm176_vm5, %v370_v39  ;;  %807 = vmatmul.msk.f32.vlgmr.msrb.gmra.mxu1 %vm176_vm5, %v370_v39 }
 0x6f1   :  { %750 = vmatpush.msrb.mxu1 %v709_v33 }
 0x76d   :  { %v392_v42 = vpop.f32.mrf.mxu1 }
 0x76e   :  { %v395_v43 = vadd.f32 %v392_v42, %v158_v41  ;;  %v163_v41 = vpop.f32.mrf.mxu0 }
 0x76f   :  { %v164_v42 = vadd.f32 %v1106_v14, %v163_v41 }
 0x770   :  { %872 = vtanh.f32 %v395_v43  ;;  %v808_v47 = vmul.f32 -1.442695, %v395_v43 }
 0x772   :  { %874 = vpow2.f32 %v808_v47  ;;  %v1171_v47 = vld [vmem:[%s1246_s5] ss:$0 sm:$0xff] }
 0x776   :  { %v873_v44 = vpop.eup %872 }
 0x777   :  { %418 = vrot.lane.b32.xlu0 %v873_v44, %s1021_s17 }
 0x778   :  { %v875_v48 = vpop.eup %874 }
 0x779   :  { %v399_v49 = vadd.f32 1.0, %v875_v48 }
 0x77b   :  { %876 = vrcp.f32 %v399_v49  ;;  %v411_v55 = vand.u32 2147483648, %v399_v49  ;;  %vm405_vm15 = vweird.f32 %v399_v49  ;;  %v409_v56 = vand.u32 2147483647, %v399_v49 }
 0x77d   :  { %v412_v58 = vor.u32 1.1754944e-38, %v411_v55  ;;  %vm410_vm2 = vcmp.eq.f32.partialorder %v409_v56, 8.507059e+37 }
 0x781   :  { %v877_v50 = vpop.eup %876 }
 0x782   :  { %v401_v51 = vmul.f32 %v877_v50, %v399_v49  ;;  %vm406_vm14 = vweird.f32 %v877_v50 }
 0x783   :  { %vm407_vm1 = vmor %vm405_vm15, %vm406_vm14 }
 0x784   :  { %v402_v52 = vsub.f32 1.0, %v401_v51 }
 0x786   :  { %v403_v53 = vmul.f32 %v877_v50, %v402_v52 }
 0x788   :  { %v404_v54 = vadd.f32 %v877_v50, %v403_v53 }
 0x78a   :  { %v408_v57 = vsel %vm407_vm1, %v877_v50, %v404_v54 }
 0x78b   :  { %v413_v60 = vsel %vm410_vm2, %v412_v58, %v408_v57 }
 0x78c   :  { %v416_v62 = vmul.f32 %v413_v60, %v361_v34  ;;  %v708_v34 = vld [vmem:[#allocation8 + $0x10] sm:$0xff] }
 0x78d   :  { %834 = vmatpush.msra.mxu3 %v708_v34  ;;  %751 = vmatpush.msrb.mxu1 %v708_v34 }
 0x78f   :  { %835 = vmatpush.msra.mxu3 %v707_v36  ;;  %752 = vmatpush.msrb.mxu1 %v707_v36 }
 0x791   :  { %836 = vmatpush.msra.mxu3 %v706_v37  ;;  %753 = vmatpush.msrb.mxu1 %v706_v37 }
 0x7e9   :  { %v419_v59 = vpop.permute.xlu0 %418 }
 0x7ea   :  { %v421_v61 = vmul.f32 %v419_v59, %v413_v60 }
 0x7ec   :  { %423 = vrot.lane.b32.xlu1 %v421_v61, %s1022_s2 }
 0x85e   :  { %v424_v63 = vpop.permute.xlu1 %423 }
 0x85f   :  { %v426_v0 = vadd.f32 %v424_v63, %v416_v62 }
 0x861   :  { %878 = vtanh.f32 %v426_v0 }
 0x867   :  { %v879_v1 = vpop.eup %878 }
 0x868   :  { %429 = vrot.lane.b32.xlu2 %v879_v1, %s1021_s17 }
 0x8c2   :  { %v430_v2 = vpop.permute.xlu2 %429 }
 0x8c3   :  { %v432_v3 = vmul.f32 %v430_v2, %v413_v60 }
 0x8c5   :  { %434 = vrot.lane.b32.xlu0 %v432_v3, %s1022_s2 }
 0x937   :  { %v435_v5 = vpop.permute.xlu0 %434 }
 0x938   :  { %437 = vst.msk [vmem:[#allocation2 + $0x18] sm:$0xff] %vm176_vm5, %v435_v5  ;;  %809 = vmatmul.msk.f32.vlgmr.msra.gmra.mxu2 %vm176_vm5, %v435_v5 }
 0x93f   :  { %v701_v39 = vld [vmem:[#allocation2 + $0x18] sm:$0xff] }
 0x9bb   :  { %v457_v8 = vpop.f32.mrf.mxu2 }
 0x9bc   :  { %v460_v9 = vadd.f32 %v457_v8, %v161_v7 }
 0x9be   :  { %880 = vtanh.f32 %v460_v9  ;;  %v810_v11 = vmul.f32 -1.442695, %v460_v9 }
 0x9c0   :  { %882 = vpow2.f32 %v810_v11  ;;  %v698_v11 = vld [vmem:[#allocation2] sm:$0xff] }
 0x9c4   :  { %v881_v10 = vpop.eup %880 }
 0x9c5   :  { %483 = vrot.lane.b32.xlu1 %v881_v10, %s1021_s17 }
 0x9c6   :  { %v883_v12 = vpop.eup %882 }
 0x9c7   :  { %v464_v13 = vadd.f32 1.0, %v883_v12 }
 0x9c9   :  { %884 = vrcp.f32 %v464_v13  ;;  %v476_v20 = vand.u32 2147483648, %v464_v13  ;;  %vm470_vm4 = vweird.f32 %v464_v13  ;;  %v474_v21 = vand.u32 2147483647, %v464_v13 }
 0x9cb   :  { %v477_v23 = vor.u32 1.1754944e-38, %v476_v20  ;;  %vm475_vm7 = vcmp.eq.f32.partialorder %v474_v21, 8.507059e+37 }
 0x9cf   :  { %v885_v15 = vpop.eup %884 }
 0x9d0   :  { %v466_v16 = vmul.f32 %v885_v15, %v464_v13  ;;  %vm471_vm3 = vweird.f32 %v885_v15  ;;  %v699_v13 = vld [vmem:[#allocation2 + $0x8] sm:$0xff] }
 0x9d1   :  { %vm472_vm6 = vmor %vm470_vm4, %vm471_vm3 }
 0x9d2   :  { %v467_v17 = vsub.f32 1.0, %v466_v16  ;;  %v167_v16 = vadd.f32 %v1106_v14, %v1126_v45 }
 0x9d4   :  { %v468_v18 = vmul.f32 %v885_v15, %v467_v17 }
 0x9d6   :  { %v469_v19 = vadd.f32 %v885_v15, %v468_v18 }
 0x9d8   :  { %v473_v22 = vsel %vm472_vm6, %v885_v15, %v469_v19  ;;  %v700_v15 = vld [vmem:[#allocation2 + $0x10] sm:$0xff] }
 0x9d9   :  { %v478_v25 = vsel %vm475_vm7, %v477_v23, %v473_v22 }
 0x9da   :  { %v481_v27 = vmul.f32 %v478_v25, %v426_v0 }
 0xa37   :  { %v484_v24 = vpop.permute.xlu1 %483 }
 0xa38   :  { %v486_v26 = vmul.f32 %v484_v24, %v478_v25 }
 0xa3a   :  { %488 = vrot.lane.b32.xlu2 %v486_v26, %s1022_s2 }
 0xa94   :  { %v489_v28 = vpop.permute.xlu2 %488 }
 0xa95   :  { %v1157_v29 = vadd.f32 %v489_v28, %v481_v27 }
 0xa97   :  { %886 = vtanh.f32 %v1157_v29 }
 0xa9d   :  { %v887_v30 = vpop.eup %886 }
 0xa9e   :  { %494 = vrot.lane.b32.xlu0 %v887_v30, %s1021_s17 }
 0xb10   :  { %v495_v31 = vpop.permute.xlu0 %494 }
 0xb11   :  { %v497_v32 = vmul.f32 %v495_v31, %v478_v25 }
 0xb13   :  { %499 = vrot.lane.b32.xlu1 %v497_v32, %s1022_s2 }
 0xb85   :  { %v500_v38 = vpop.permute.xlu1 %499 }
 0xb86   :  { %502 = vst.msk [vmem:[#allocation2 + $0x20] sm:$0xff] %vm176_vm5, %v500_v38  ;;  %811 = vmatmul.msk.f32.vlgmr.msrb.gmra.mxu3 %vm176_vm5, %v500_v38 }
 0xb8d   :  { %v702_v40 = vld [vmem:[#allocation2 + $0x20] sm:$0xff] }
 0xb8e   :  { %820 = vmatmul.msk.f32.vlgmr.msra.gmra.mxu3 %vm176_vm5, %v701_v39 }
 0xb96   :  { %821 = vmatmul.msk.f32.gmra.mxu3 %vm176_vm5, %v702_v40 }
 0xc09   :  { %v522_v43 = vpop.f32.mrf.mxu3 }
 0xc0a   :  { %v525_v44 = vadd.f32 %v522_v43, %v164_v42 }
 0xc0c   :  { %888 = vtanh.f32 %v525_v44  ;;  %v812_v53 = vmul.f32 -1.442695, %v525_v44 }
 0xc0e   :  { %890 = vpow2.f32 %v812_v53  ;;  %v170_v53 = vadd.f32 %v1106_v14, %v1128_v46 }
 0xc11   :  { %v764_v48 = vpop.f32.mrf.mxu3 }
 0xc12   :  { %v889_v49 = vpop.eup %888  ;;  %v765_v50 = vadd.f32 %v1171_v47, %v764_v48 }
 0xc13   :  { %548 = vrot.lane.b32.xlu2 %v889_v49, %s1021_s17 }
 0xc14   :  { %782 = vst.msk [vmem:[%s1247_s6 + $0x18] sm:$0xff] %vm176_vm5, %v765_v50  ;;  %v891_v54 = vpop.eup %890 }
 0xc15   :  { %v529_v55 = vadd.f32 1.0, %v891_v54 }
 0xc17   :  { %892 = vrcp.f32 %v529_v55  ;;  %v541_v61 = vand.u32 2147483648, %v529_v55  ;;  %vm535_vm8 = vweird.f32 %v529_v55  ;;  %v539_v62 = vand.u32 2147483647, %v529_v55 }
 0xc19   :  { %v767_v51 = vpop.f32.mrf.mxu3  ;;  %v542_v0 = vor.u32 1.1754944e-38, %v541_v61  ;;  %vm540_vm10 = vcmp.eq.f32.partialorder %v539_v62, 8.507059e+37 }
 0xc1a   :  { %v768_v52 = vadd.f32 %v1171_v47, %v767_v51 }
 0xc1c   :  { %783 = vst.msk [vmem:[%s1247_s6 + $0x20] sm:$0xff] %vm176_vm5, %v768_v52 }
 0xc1d   :  { %v893_v56 = vpop.eup %892 }
 0xc1e   :  { %v531_v57 = vmul.f32 %v893_v56, %v529_v55  ;;  %vm536_vm0 = vweird.f32 %v893_v56 }
 0xc1f   :  { %vm537_vm9 = vmor %vm535_vm8, %vm536_vm0 }
 0xc20   :  { %v532_v58 = vsub.f32 1.0, %v531_v57 }
 0xc22   :  { %v533_v59 = vmul.f32 %v893_v56, %v532_v58 }
 0xc24   :  { %v534_v60 = vadd.f32 %v893_v56, %v533_v59 }
 0xc26   :  { %v538_v63 = vsel %vm537_vm9, %v893_v56, %v534_v60 }
 0xc27   :  { %v543_v2 = vsel %vm540_vm10, %v542_v0, %v538_v63 }
 0xc28   :  { %v546_v4 = vmul.f32 %v543_v2, %v1157_v29 }
 0xc6d   :  { %v549_v1 = vpop.permute.xlu2 %548 }
 0xc6e   :  { %v551_v3 = vmul.f32 %v549_v1, %v543_v2 }
 0xc70   :  { %553 = vrot.lane.b32.xlu0 %v551_v3, %s1022_s2 }
 0xce2   :  { %v554_v5 = vpop.permute.xlu0 %553 }
 0xce3   :  { %v556_v6 = vadd.f32 %v554_v5, %v546_v4 }
 0xce5   :  { %894 = vtanh.f32 %v556_v6 }
 0xceb   :  { %v895_v7 = vpop.eup %894 }
 0xcec   :  { %559 = vrot.lane.b32.xlu1 %v895_v7, %s1021_s17 }
 0xd5e   :  { %v560_v8 = vpop.permute.xlu1 %559 }
 0xd5f   :  { %v562_v9 = vmul.f32 %v560_v8, %v543_v2 }
 0xd61   :  { %564 = vrot.lane.b32.xlu2 %v562_v9, %s1022_s2 }
 0xdbb   :  { %v565_v10 = vpop.permute.xlu2 %564 }
 0xdbc   :  { %567 = vst.msk [vmem:[#allocation2 + $0x28] sm:$0xff] %vm176_vm5, %v565_v10  ;;  %813 = vmatmul.msk.f32.vlgmr.msra.gmra.mxu1 %vm176_vm5, %v565_v10 }
 0xdc3   :  { %v703_v12 = vld [vmem:[#allocation2 + $0x28] sm:$0xff] }
 0xdc4   :  { %817 = vmatmul.msk.f32.vlgmr.msrb.gmra.mxu1 %vm176_vm5, %v698_v11  ;;  %822 = vmatmul.msk.f32.gmra.mxu3 %vm176_vm5, %v703_v12 }
 0xdcc   :  { %818 = vmatmul.msk.f32.gmra.mxu1 %vm176_vm5, %v699_v13 }
 0xdd4   :  { %819 = vmatmul.msk.f32.gmra.mxu1 %vm176_vm5, %v700_v15 }
 0xe39   :  { %v587_v17 = vpop.f32.mrf.mxu1 }
 0xe3a   :  { %v590_v18 = vadd.f32 %v587_v17, %v167_v16 }
 0xe3c   :  { %896 = vtanh.f32 %v590_v18  ;;  %v814_v27 = vmul.f32 -1.442695, %v590_v18 }
 0xe3e   :  { %898 = vpow2.f32 %v814_v27 }
 0xe41   :  { %v755_v19 = vpop.f32.mrf.mxu1 }
 0xe42   :  { %v897_v20 = vpop.eup %896  ;;  %v756_v21 = vadd.f32 %v1171_v47, %v755_v19 }
 0xe43   :  { %613 = vrot.lane.b32.xlu0 %v897_v20, %s1021_s17 }
 0xe44   :  { %779 = vst.msk [vmem:[%s1247_s6] sm:$0xff] %vm176_vm5, %v756_v21  ;;  %v899_v28 = vpop.eup %898 }
 0xe45   :  { %v594_v29 = vadd.f32 1.0, %v899_v28 }
 0xe47   :  { %v770_v22 = vpop.f32.mrf.mxu3  ;;  %900 = vrcp.f32 %v594_v29  ;;  %v606_v35 = vand.u32 2147483648, %v594_v29  ;;  %vm600_vm12 = vweird.f32 %v594_v29  ;;  %v604_v36 = vand.u32 2147483647, %v594_v29 }
 0xe48   :  { %v771_v23 = vadd.f32 %v1171_v47, %v770_v22 }
 0xe49   :  { %v758_v24 = vpop.f32.mrf.mxu1  ;;  %v607_v38 = vor.u32 1.1754944e-38, %v606_v35  ;;  %vm605_vm14 = vcmp.eq.f32.partialorder %v604_v36, 8.507059e+37 }
 0xe4a   :  { %784 = vst.msk [vmem:[%s1247_s6 + $0x28] sm:$0xff] %vm176_vm5, %v771_v23  ;;  %v759_v45 = vadd.f32 %v1171_v47, %v758_v24 }
 0xe4c   :  { %780 = vst.msk [vmem:[%s1247_s6 + $0x8] sm:$0xff] %vm176_vm5, %v759_v45 }
 0xe4d   :  { %v901_v30 = vpop.eup %900 }
 0xe4e   :  { %v596_v31 = vmul.f32 %v901_v30, %v594_v29  ;;  %vm601_vm11 = vweird.f32 %v901_v30 }
 0xe4f   :  { %vm602_vm13 = vmor %vm600_vm12, %vm601_vm11 }
 0xe50   :  { %v597_v32 = vsub.f32 1.0, %v596_v31 }
 0xe51   :  { %v761_v25 = vpop.f32.mrf.mxu1 }
 0xe52   :  { %v762_v26 = vadd.f32 %v1171_v47, %v761_v25  ;;  %v598_v33 = vmul.f32 %v901_v30, %v597_v32 }
 0xe54   :  { %781 = vst.msk [vmem:[%s1247_s6 + $0x10] sm:$0xff] %vm176_vm5, %v762_v26  ;;  %v599_v34 = vadd.f32 %v901_v30, %v598_v33 }
 0xe56   :  { %v603_v37 = vsel %vm602_vm13, %v901_v30, %v599_v34 }
 0xe57   :  { %v608_v40 = vsel %vm605_vm14, %v607_v38, %v603_v37 }
 0xe58   :  { %v611_v42 = vmul.f32 %v608_v40, %v556_v6 }
 0xeb5   :  { %v614_v39 = vpop.permute.xlu0 %613 }
 0xeb6   :  { %v616_v41 = vmul.f32 %v614_v39, %v608_v40 }
 0xeb8   :  { %618 = vrot.lane.b32.xlu1 %v616_v41, %s1022_s2 }
 0xf2a   :  { %v619_v43 = vpop.permute.xlu1 %618 }
 0xf2b   :  { %v621_v44 = vadd.f32 %v619_v43, %v611_v42 }
 0xf2d   :  { %902 = vtanh.f32 %v621_v44 }
 0xf33   :  { %v903_v48 = vpop.eup %902 }
 0xf34   :  { %624 = vrot.lane.b32.xlu2 %v903_v48, %s1021_s17 }
 0xf8e   :  { %v625_v49 = vpop.permute.xlu2 %624 }
 0xf8f   :  { %v627_v50 = vmul.f32 %v625_v49, %v608_v40 }
 0xf91   :  { %629 = vrot.lane.b32.xlu0 %v627_v50, %s1022_s2 }
0x1003   :  { %v630_v51 = vpop.permute.xlu0 %629 }
0x1004   :  { %632 = vst.msk [vmem:[#allocation2 + $0x30] sm:$0xff] %vm176_vm5, %v630_v51  ;;  %815 = vmatmul.msk.f32.vlgmr.msrb.gmra.mxu2 %vm176_vm5, %v630_v51 }
0x100b   :  { %v704_v52 = vld [vmem:[#allocation2 + $0x30] sm:$0xff] }
0x100c   :  { %823 = vmatmul.msk.f32.gmra.mxu3 %vm176_vm5, %v704_v52 }
0x1087   :  { %v652_v54 = vpop.f32.mrf.mxu2 }
0x1088   :  { %v655_v55 = vadd.f32 %v652_v54, %v170_v53 }
0x108a   :  { %904 = vtanh.f32 %v655_v55  ;;  %v816_v59 = vmul.f32 -1.442695, %v655_v55 }
0x108c   :  { %906 = vpow2.f32 %v816_v59 }
0x108f   :  { %v773_v56 = vpop.f32.mrf.mxu3 }
0x1090   :  { %v905_v57 = vpop.eup %904  ;;  %v774_v58 = vadd.f32 %v1171_v47, %v773_v56 }
0x1091   :  { %678 = vrot.lane.b32.xlu1 %v905_v57, %s1021_s17 }
0x1092   :  { %785 = vst.msk [vmem:[%s1247_s6 + $0x30] sm:$0xff] %vm176_vm5, %v774_v58  ;;  %v907_v60 = vpop.eup %906 }
0x1093   :  { %v659_v61 = vadd.f32 1.0, %v907_v60 }
0x1095   :  { %908 = vrcp.f32 %v659_v61  ;;  %v671_v1 = vand.u32 2147483648, %v659_v61  ;;  %vm665_vm1 = vweird.f32 %v659_v61  ;;  %v669_v2 = vand.u32 2147483647, %v659_v61 }
0x1097   :  { %v672_v4 = vor.u32 1.1754944e-38, %v671_v1  ;;  %vm670_vm3 = vcmp.eq.f32.partialorder %v669_v2, 8.507059e+37 }
0x109b   :  { %v909_v14 = vpop.eup %908 }
0x109c   :  { %v661_v46 = vmul.f32 %v909_v14, %v659_v61  ;;  %vm666_vm15 = vweird.f32 %v909_v14 }
0x109d   :  { %vm667_vm2 = vmor %vm665_vm1, %vm666_vm15 }
0x109e   :  { %v662_v62 = vsub.f32 1.0, %v661_v46 }
0x10a0   :  { %v663_v63 = vmul.f32 %v909_v14, %v662_v62 }
0x10a2   :  { %v664_v0 = vadd.f32 %v909_v14, %v663_v63 }
0x10a4   :  { %v668_v3 = vsel %vm667_vm2, %v909_v14, %v664_v0 }
0x10a5   :  { %v673_v6 = vsel %vm670_vm3, %v672_v4, %v668_v3 }
0x10a6   :  { %v676_v8 = vmul.f32 %v673_v6, %v621_v44 }
0x1103   :  { %v679_v5 = vpop.permute.xlu1 %678 }
0x1104   :  { %v681_v7 = vmul.f32 %v679_v5, %v673_v6 }
0x1106   :  { %683 = vrot.lane.b32.xlu2 %v681_v7, %s1022_s2 }
0x1160   :  { %v684_v9 = vpop.permute.xlu2 %683 }
0x1161   :  { %v686_v10 = vadd.f32 %v684_v9, %v676_v8 }
0x1163   :  { %910 = vtanh.f32 %v686_v10 }
0x1169   :  { %v911_v11 = vpop.eup %910 }
0x116a   :  { %689 = vrot.lane.b32.xlu0 %v911_v11, %s1021_s17 }
0x11dc   :  { %v690_v12 = vpop.permute.xlu0 %689 }
0x11dd   :  { %v692_v13 = vmul.f32 %v690_v12, %v673_v6 }
0x11df   :  { %694 = vrot.lane.b32.xlu1 %v692_v13, %s1022_s2 }
0x1251   :  { %v695_v15 = vpop.permute.xlu1 %694 }
0x1252   :  { %697 = vst.msk [vmem:[#allocation2 + $0x38] sm:$0xff] %vm176_vm5, %v695_v15 }
0x1259   :  { %v705_v16 = vld [vmem:[#allocation2 + $0x38] sm:$0xff] }
0x125a   :  { %824 = vmatmul.msk.f32.gmra.mxu3 %vm176_vm5, %v705_v16 }
0x12dd   :  { %v776_v17 = vpop.f32.mrf.mxu3 }
0x12de   :  { %v777_v18 = vadd.f32 %v1171_v47, %v776_v17 }
0x12e0   :  { %786 = vst.msk [vmem:[%s1247_s6 + $0x38] sm:$0xff] %vm176_vm5, %v777_v18 }
0x12e1   :  { %791 = vsyncpa [#allocation4], 1 }
0x12e2   :  { %792 = vsyncpa [#allocation6], 1 }
0x12e3   :  { %793 = vsyncpa [#allocation9], 1 }

</bundles_post_ra>
